<compile_context>
chip_gen: v5e
topology: v5e:2x2
jax: 0.10.0
libtpu: 0.0.40
codegen_flags: <defaults>
</compile_context>

<pallas_src>
import functools
import math

import jax
import jax.numpy as jnp
from jax import lax
from jax.experimental import pallas as pl
from jax.experimental.pallas import tpu as pltpu

HIDDEN_LAYER_DIMENSIONS = [128, 64]

_VMEM_TILE_BUDGET = 32 * 1024 * 1024   # budget used to cap the batch tile (fits v7x 64 MiB/TC)
_VMEM_LIMIT_BYTES = 48 * 1024 * 1024   # raise the 16/32 MiB scoped default, stay < 64 MiB


def _mlp_kernel(emb_ref, karma_ref, w1e_ref, w1k_ref, b1_ref,
                w2_ref, b2_ref, wo_ref, b3_ref, o_ref):
    # emb_ref:   (TB, E)   streamed per grid step (f32 or bf16 from the caller)
    # karma_ref: (TB, 1)   streamed per grid step
    # w1e: (E, 128) bf16,  w1k: (1, 128),  b1: (1, 128)     (VMEM-resident)
    # w2:  (128, 64), b2: (1, 64), wo: (1, 64), b3: (1, 1)  (VMEM-resident)
    # o_ref: (1, 1, TB)    lane-dense output row

    # Layer 1 (E -> 128): bf16 operands, f32 accumulation on the MXU.
    emb = emb_ref[...].astype(jnp.bfloat16)
    h1 = jnp.dot(emb, w1e_ref[...], preferred_element_type=jnp.float32)
    # Karma column of the (virtual) concat fused as a rank-1 update (f32).
    h1 = h1 + karma_ref[...] * w1k_ref[...] + b1_ref[...]
    h1 = jnp.maximum(h1, 0.0)

    # Layer 2 (128 -> 64): tiny, keep f32 for accuracy.
    h2 = jnp.dot(h1, w2_ref[...], preferred_element_type=jnp.float32) + b2_ref[...]
    h2 = jnp.maximum(h2, 0.0)

    # Layer 3 (64 -> 1): contract the lane axis of both operands so the result
    # is a (1, TB) lane-major row -- no sublane->lane relayout before the store.
    out = lax.dot_general(wo_ref[...], h2,
                          dimension_numbers=(((1,), (1,)), ((), ())),
                          preferred_element_type=jnp.float32)          # (1, TB)
    o_ref[...] = (out + b3_ref[...])[None].astype(o_ref.dtype)


def _round_up(x, m):
    return ((x + m - 1) // m) * m


def _choose_tile(batch, edim, block_b):
    """Pick a batch tile: lane-dense output, VMEM-budgeted, >=2 grid steps when possible."""
    if batch <= 128:
        tb = _round_up(max(batch, 1), 8)
        return tb, pl.cdiv(batch, tb)
    # Per-row VMEM bytes: double-buffered f32 emb tile (8E) + in-kernel bf16 copy
    # (2E) + f32 h1/h2 intermediates + karma/output buffers (~1 KiB of slack).
    per_row = 10 * edim + 1024
    tb_cap = max(128, (_VMEM_TILE_BUDGET // per_row) // 128 * 128)
    tb = min(_round_up(block_b, 128), _round_up(batch, 128), tb_cap)
    if pl.cdiv(batch, tb) == 1:
        # v7x megacore: ensure both TensorCores get at least one grid step.
        tb = max(128, _round_up(pl.cdiv(batch, 2), 128))
    return tb, pl.cdiv(batch, tb)


@functools.partial(jax.jit, static_argnames=("block_b",))
def upvote_predictor_forward(title_embedding, karma, params, *, block_b=1024):
    """title_embedding: (B, E) f32/bf16, karma: (B, 1) f32 -> (B,) f32"""
    B, E = title_embedding.shape
    w1e, w1k, b1, w2, b2, wo, b3 = params

    tb, g = _choose_tile(B, E, block_b)

    # Weights/biases: constant index_map -> fetched once, resident in VMEM.
    resident = lambda shape: pl.BlockSpec(shape, lambda i: (0, 0))

    out = pl.pallas_call(
        _mlp_kernel,
        out_shape=jax.ShapeDtypeStruct((g, 1, tb), jnp.float32),
        grid=(g,),
        in_specs=[
            pl.BlockSpec((tb, E), lambda i: (i, 0)),   # embedding tile (edge blocks handled)
            pl.BlockSpec((tb, 1), lambda i: (i, 0)),   # karma tile
            resident(w1e.shape),
            resident(w1k.shape),
            resident(b1.shape),
            resident(w2.shape),
            resident(b2.shape),
            resident(wo.shape),
            resident(b3.shape),
        ],
        out_specs=pl.BlockSpec((1, 1, tb), lambda i: (i, 0, 0)),
        compiler_params=pltpu.CompilerParams(
            dimension_semantics=("parallel",),
            vmem_limit_bytes=_VMEM_LIMIT_BYTES),
    )(title_embedding, karma, w1e, w1k, b1, w2, b2, wo, b3)

    # Rows [B, g*tb) are edge-block garbage; safe to discard because every batch
    # row is independent (no cross-row reduction anywhere in the kernel).
    return out.reshape(-1)[:B]  # (B,)  == squeeze(-1) of the (B,1) result


def init_params(embedding_dim, key):
    """Deterministic init mimicking nn.Linear's uniform(-1/sqrt(fan_in), ...).

    W1 is pre-split into (embedding part in bf16, karma column in f32) and W3 is
    stored as a (1, 64) row so the kernel needs no in-kernel transposes/slices.
    """
    dims = [embedding_dim + 1] + HIDDEN_LAYER_DIMENSIONS + [1]
    keys = jax.random.split(key, 2 * (len(dims) - 1))
    raw = []
    for li in range(len(dims) - 1):
        fan_in, fan_out = dims[li], dims[li + 1]
        bound = 1.0 / math.sqrt(fan_in)
        w = jax.random.uniform(keys[2 * li], (fan_in, fan_out),
                               minval=-bound, maxval=bound, dtype=jnp.float32)
        b = jax.random.uniform(keys[2 * li + 1], (1, fan_out),
                               minval=-bound, maxval=bound, dtype=jnp.float32)
        raw.extend([w, b])
    w1, b1, w2, b2, w3, b3 = raw
    w1_emb = w1[:embedding_dim].astype(jnp.bfloat16)   # (E, 128) bf16 (MXU operand)
    w1_karma = w1[embedding_dim:embedding_dim + 1]     # (1, 128)  f32
    wo = w3.T                                          # (1, 64)   f32
    return (w1_emb, w1_karma, b1, w2, b2, wo, b3)


def _reference_forward(title_embedding, karma, params):
    """Pure-JAX f32 reference (bf16 layer-1 weights upcast back to f32)."""
    w1e, w1k, b1, w2, b2, wo, b3 = params
    x = title_embedding.astype(jnp.float32) @ w1e.astype(jnp.float32)
    x = x + karma * w1k + b1
    x = jnp.maximum(x, 0.0)
    x = jnp.maximum(x @ w2 + b2, 0.0)
    x = x @ wo.T + b3
    return x[:, 0]


if __name__ == "__main__":
    key = jax.random.PRNGKey(0)
    k1, k2, k3, k4, k5 = jax.random.split(key, 5)

    # --- small-shape check (matches the module's expected input layout) ---
    batch, embedding_dim = 8, 32
    title_embedding = jax.random.normal(k1, (batch, embedding_dim), dtype=jnp.float32)
    karma = jax.random.normal(k2, (batch, 1), dtype=jnp.float32)
    params = init_params(embedding_dim, k3)

    out = jax.block_until_ready(upvote_predictor_forward(title_embedding, karma, params))
    ref = _reference_forward(title_embedding, karma, params)
    assert out.shape == (batch,), out.shape
    assert jnp.allclose(out, ref, atol=2e-2, rtol=2e-2), (out, ref)

    # --- multi-step grid + ragged batch (edge blocks, no wrapper-side pad) ---
    batch2, edim2 = 300, 128
    emb2 = jax.random.normal(k4, (batch2, edim2), dtype=jnp.float32)
    karma2 = jax.random.normal(k5, (batch2, 1), dtype=jnp.float32)
    params2 = init_params(edim2, k3)
    out2 = jax.block_until_ready(upvote_predictor_forward(emb2, karma2, params2))
    ref2 = _reference_forward(emb2, karma2, params2)
    assert out2.shape == (batch2,), out2.shape
    assert jnp.allclose(out2, ref2, atol=2e-2, rtol=2e-2), (out2, ref2)

    print("KERNEL_OK")
</pallas_src>

<mosaic_0001>
module attributes {stable_mosaic.version = 11 : i64} {
  func.func @_mlp_kernel(%arg0: i32, %arg1: memref<8x32xf32, #tpu.memory_space<vmem>>, %arg2: memref<8x1xf32, #tpu.memory_space<vmem>>, %arg3: memref<32x128xbf16, #tpu.memory_space<vmem>>, %arg4: memref<1x128xf32, #tpu.memory_space<vmem>>, %arg5: memref<1x128xf32, #tpu.memory_space<vmem>>, %arg6: memref<128x64xf32, #tpu.memory_space<vmem>>, %arg7: memref<1x64xf32, #tpu.memory_space<vmem>>, %arg8: memref<1x64xf32, #tpu.memory_space<vmem>>, %arg9: memref<1x1xf32, #tpu.memory_space<vmem>>, %arg10: memref<1x1x8xf32, #tpu.memory_space<vmem>>) attributes {dimension_semantics = [#tpu.dimension_semantics<parallel>], iteration_bounds = array<i64: 1>, scalar_prefetch = 0 : i64, scratch_operands = 0 : i64, tpu.core_type = #tpu.core_type<tc>, window_params = [{transform_indices = @transform_0, window_bounds = array<i64: 8, 32>}, {transform_indices = @transform_1, window_bounds = array<i64: 8, 1>}, {pipeline_mode = #tpu.pipeline_mode<synchronous>, transform_indices = @transform_2, window_bounds = array<i64: 32, 128>}, {pipeline_mode = #tpu.pipeline_mode<synchronous>, transform_indices = @transform_3, window_bounds = array<i64: 1, 128>}, {pipeline_mode = #tpu.pipeline_mode<synchronous>, transform_indices = @transform_4, window_bounds = array<i64: 1, 128>}, {pipeline_mode = #tpu.pipeline_mode<synchronous>, transform_indices = @transform_5, window_bounds = array<i64: 128, 64>}, {pipeline_mode = #tpu.pipeline_mode<synchronous>, transform_indices = @transform_6, window_bounds = array<i64: 1, 64>}, {pipeline_mode = #tpu.pipeline_mode<synchronous>, transform_indices = @transform_7, window_bounds = array<i64: 1, 64>}, {pipeline_mode = #tpu.pipeline_mode<synchronous>, transform_indices = @transform_8, window_bounds = array<i64: 1, 1>}, {transform_indices = @transform_9, window_bounds = array<i64: 1, 1, 8>}]} {
    %c0 = arith.constant 0 : index
    %c0_0 = arith.constant 0 : index
    %0 = vector.load %arg1[%c0, %c0_0] : memref<8x32xf32, #tpu.memory_space<vmem>>, vector<8x32xf32>
    %1 = arith.truncf %0 : vector<8x32xf32> to vector<8x32xbf16>
    %c0_1 = arith.constant 0 : index
    %c0_2 = arith.constant 0 : index
    %2 = vector.load %arg3[%c0_1, %c0_2] : memref<32x128xbf16, #tpu.memory_space<vmem>>, vector<32x128xbf16>
    %cst = arith.constant dense<0.000000e+00> : vector<8x128xf32>
    %3 = tpu.matmul %1, %2, %cst {dimension_numbers = #tpu.dot_dimension_numbers<[1], [0], [0], [1], [0, 0, 1, 1], [], []>} : vector<8x32xbf16>, vector<32x128xbf16>, vector<8x128xf32> -> vector<8x128xf32>
    %c0_3 = arith.constant 0 : index
    %c0_4 = arith.constant 0 : index
    %4 = vector.load %arg2[%c0_3, %c0_4] : memref<8x1xf32, #tpu.memory_space<vmem>>, vector<8x1xf32>
    %c0_5 = arith.constant 0 : index
    %c0_6 = arith.constant 0 : index
    %5 = vector.load %arg4[%c0_5, %c0_6] : memref<1x128xf32, #tpu.memory_space<vmem>>, vector<1x128xf32>
    %6 = vector.broadcast %4 : vector<8x1xf32> to vector<8x128xf32>
    %7 = vector.broadcast %5 : vector<1x128xf32> to vector<8x128xf32>
    %8 = arith.mulf %6, %7 : vector<8x128xf32>
    %9 = arith.addf %3, %8 : vector<8x128xf32>
    %c0_7 = arith.constant 0 : index
    %c0_8 = arith.constant 0 : index
    %10 = vector.load %arg5[%c0_7, %c0_8] : memref<1x128xf32, #tpu.memory_space<vmem>>, vector<1x128xf32>
    %11 = vector.broadcast %10 : vector<1x128xf32> to vector<8x128xf32>
    %12 = arith.addf %9, %11 : vector<8x128xf32>
    %cst_9 = arith.constant 0.000000e+00 : f32
    %13 = vector.broadcast %cst_9 : f32 to vector<8x128xf32>
    %14 = arith.maximumf %12, %13 : vector<8x128xf32>
    %c0_10 = arith.constant 0 : index
    %c0_11 = arith.constant 0 : index
    %15 = vector.load %arg6[%c0_10, %c0_11] : memref<128x64xf32, #tpu.memory_space<vmem>>, vector<128x64xf32>
    %cst_12 = arith.constant dense<0.000000e+00> : vector<8x64xf32>
    %16 = tpu.matmul %14, %15, %cst_12 {dimension_numbers = #tpu.dot_dimension_numbers<[1], [0], [0], [1], [0, 0, 1, 1], [], []>} : vector<8x128xf32>, vector<128x64xf32>, vector<8x64xf32> -> vector<8x64xf32>
    %c0_13 = arith.constant 0 : index
    %c0_14 = arith.constant 0 : index
    %17 = vector.load %arg7[%c0_13, %c0_14] : memref<1x64xf32, #tpu.memory_space<vmem>>, vector<1x64xf32>
    %18 = vector.broadcast %17 : vector<1x64xf32> to vector<8x64xf32>
    %19 = arith.addf %16, %18 : vector<8x64xf32>
    %cst_15 = arith.constant 0.000000e+00 : f32
    %20 = vector.broadcast %cst_15 : f32 to vector<8x64xf32>
    %21 = arith.maximumf %19, %20 : vector<8x64xf32>
    %c0_16 = arith.constant 0 : index
    %c0_17 = arith.constant 0 : index
    %22 = vector.load %arg8[%c0_16, %c0_17] : memref<1x64xf32, #tpu.memory_space<vmem>>, vector<1x64xf32>
    %cst_18 = arith.constant dense<0.000000e+00> : vector<1x8xf32>
    %23 = tpu.matmul %22, %21, %cst_18 {dimension_numbers = #tpu.dot_dimension_numbers<[1], [1], [0], [0], [0, 0, 1, 0], [], []>} : vector<1x64xf32>, vector<8x64xf32>, vector<1x8xf32> -> vector<1x8xf32>
    %c0_19 = arith.constant 0 : index
    %c0_20 = arith.constant 0 : index
    %24 = vector.load %arg9[%c0_19, %c0_20] : memref<1x1xf32, #tpu.memory_space<vmem>>, vector<1x1xf32>
    %25 = vector.broadcast %24 : vector<1x1xf32> to vector<1x8xf32>
    %26 = arith.addf %23, %25 : vector<1x8xf32>
    %27 = vector.shape_cast %26 : vector<1x8xf32> to vector<1x1x8xf32>
    %c0_21 = arith.constant 0 : index
    %c0_22 = arith.constant 0 : index
    %c0_23 = arith.constant 0 : index
    %28 = vector.load %arg10[%c0_21, %c0_22, %c0_23] : memref<1x1x8xf32, #tpu.memory_space<vmem>>, vector<1x1x8xf32>
    tpu.vector_store %arg10[%c0_21, %c0_22, %c0_23], %27 {strides = array<i32>} : memref<1x1x8xf32, #tpu.memory_space<vmem>>, vector<1x1x8xf32>,
    return
  }
  func.func @transform_0(%arg0: i32) -> (i32, i32) {
    %c0_i32 = arith.constant 0 : i32
    %c0_i32_0 = arith.constant 0 : i32
    return %arg0, %c0_i32 : i32, i32
  }
  func.func @transform_1(%arg0: i32) -> (i32, i32) {
    %c0_i32 = arith.constant 0 : i32
    %c0_i32_0 = arith.constant 0 : i32
    return %arg0, %c0_i32 : i32, i32
  }
  func.func @transform_2(%arg0: i32) -> (i32, i32) {
    %c0_i32 = arith.constant 0 : i32
    %c0_i32_0 = arith.constant 0 : i32
    %c0_i32_1 = arith.constant 0 : i32
    return %c0_i32, %c0_i32_0 : i32, i32
  }
  func.func @transform_3(%arg0: i32) -> (i32, i32) {
    %c0_i32 = arith.constant 0 : i32
    %c0_i32_0 = arith.constant 0 : i32
    %c0_i32_1 = arith.constant 0 : i32
    return %c0_i32, %c0_i32_0 : i32, i32
  }
  func.func @transform_4(%arg0: i32) -> (i32, i32) {
    %c0_i32 = arith.constant 0 : i32
    %c0_i32_0 = arith.constant 0 : i32
    %c0_i32_1 = arith.constant 0 : i32
    return %c0_i32, %c0_i32_0 : i32, i32
  }
  func.func @transform_5(%arg0: i32) -> (i32, i32) {
    %c0_i32 = arith.constant 0 : i32
    %c0_i32_0 = arith.constant 0 : i32
    %c0_i32_1 = arith.constant 0 : i32
    return %c0_i32, %c0_i32_0 : i32, i32
  }
  func.func @transform_6(%arg0: i32) -> (i32, i32) {
    %c0_i32 = arith.constant 0 : i32
    %c0_i32_0 = arith.constant 0 : i32
    %c0_i32_1 = arith.constant 0 : i32
    return %c0_i32, %c0_i32_0 : i32, i32
  }
  func.func @transform_7(%arg0: i32) -> (i32, i32) {
    %c0_i32 = arith.constant 0 : i32
    %c0_i32_0 = arith.constant 0 : i32
    %c0_i32_1 = arith.constant 0 : i32
    return %c0_i32, %c0_i32_0 : i32, i32
  }
  func.func @transform_8(%arg0: i32) -> (i32, i32) {
    %c0_i32 = arith.constant 0 : i32
    %c0_i32_0 = arith.constant 0 : i32
    %c0_i32_1 = arith.constant 0 : i32
    return %c0_i32, %c0_i32_0 : i32, i32
  }
  func.func @transform_9(%arg0: i32) -> (i32, i32, i32) {
    %c0_i32 = arith.constant 0 : i32
    %c0_i32_0 = arith.constant 0 : i32
    %c0_i32_1 = arith.constant 0 : i32
    return %arg0, %c0_i32, %c0_i32_0 : i32, i32, i32
  }
}

</mosaic_0001>

<bundles_post_ra>
// kernel: upvote_predictor_forward.1
= control target key start
LH: loop header
LB: loop body
LE: loop exit
PB: predicated region body
PF: predicated region fallthrough
CT: control target
= control target key end

     0   :  { %s357_s0 = inlined_call_operand.vmem [shape: f32[8,32], index: 0, kind: input, shape index: {}]   ;;  %s358_s1 = inlined_call_operand.vmem [shape: f32[8,1], index: 1, kind: input, shape index: {}]   ;;  %s359_s2 = inlined_call_operand.vmem [shape: bf16[32,128], index: 2, kind: input, shape index: {}]   ;;  %s360_s3 = inlined_call_operand.vmem [shape: f32[1,128], index: 3, kind: input, shape index: {}]   ;;  %s361_s4 = inlined_call_operand.vmem [shape: f32[1,128], index: 4, kind: input, shape index: {}]   ;;  %s362_s5 = inlined_call_operand.vmem [shape: f32[128,64], index: 5, kind: input, shape index: {}]   ;;  %s363_s6 = inlined_call_operand.vmem [shape: f32[1,64], index: 6, kind: input, shape index: {}]   ;;  %s364_s7 = inlined_call_operand.vmem [shape: f32[1,64], index: 7, kind: input, shape index: {}]   ;;  %s365_s8 = inlined_call_operand.<no memory space> [shape: f32[1,1], index: 8, kind: input, shape index: {}]   ;;  %s366_s9 = inlined_call_operand.hbm [shape: f32[1,1,8], index: 9, kind: output, shape index: {}]  }
   0x1   :  { %v14_v0 = vstv %s365_s8 }
   0x2   :  { %15 = vst [vmem:[#allocation2] sm:$0x1] %v14_v0 }
   0x3   :  { %v194_v1 = vld [vmem:[%s359_s2 + $0x8] sm:$0xff]  ;;  %v227_v2 = vmov 0   ;;  %v42_v3 = vld [vmem:[%s358_s1] sm:$0xff]  ;;  %v103_v4 = vld [vmem:[%s362_s5 + $0x78] sm:$0xff] }
   0x4   :  { %197 = vset.pattern.permute.xlu0 %v227_v2  ;;  %75 = vmatpush.bf16.msra.mxu0 %v194_v1  ;;  %v193_v5 = vld [vmem:[%s359_s2] sm:$0xff]  ;;  %v102_v7 = vld [vmem:[%s362_s5 + $0x70] sm:$0xff]  ;;  %v101_v8 = vld [vmem:[%s362_s5 + $0x68] sm:$0xff] }
   0x5   :  { %v36_v6 = vld [vmem:[%s357_s0] sm:$0xff]  ;;  %46 = vperm.xlu0 %197, %v42_v3   ;;  %108 = vmatpush.msra.mxu1 %v103_v4 }
   0x6   :  { %v37_v9 = vpack.c.bf16 %v36_v6, %v36_v6 }
   0x7   :  { %109 = vmatpush.msra.mxu1 %v102_v7 }
   0x8   :  { %16 = vsyncpa [#allocation4], 0  ;;  %76 = vmatpush.bf16.msra.mxu0 %v193_v5  ;;  %vm65_vm0 = vcmask 261120   ;;  %v100_v10 = vld [vmem:[%s362_s5 + $0x60] sm:$0xff]  ;;  %v99_v12 = vld [vmem:[%s362_s5 + $0x58] sm:$0xff]  ;;  %vm137_vm1 = vcmask 523264  }
   0x9   :  { %v130_v11 = vld [vmem:[#allocation2] sm:$0x1]  ;;  %110 = vmatpush.msra.mxu1 %v101_v8  ;;  %v98_v13 = vld [vmem:[%s362_s5 + $0x50] sm:$0xff]  ;;  %v97_v14 = vld [vmem:[%s362_s5 + $0x48] sm:$0xff]  ;;  %s173_s10 = sshll.u32 %s366_s9, 4  ;;  %vm164_vm2 = vcmask 57344   ;;  %s174_s10 = int_to_ptr.hbm [resolvable:$true] %s173_s10 }
   0xa   :  { %v96_v15 = vld [vmem:[%s362_s5 + $0x40] sm:$0xff]  ;;  %v95_v16 = vld [vmem:[%s362_s5 + $0x38] sm:$0xff]  ;;  %v94_v17 = vld [vmem:[%s362_s5 + $0x30] sm:$0xff] }
   0xb   :  { %190 = vmatmul.msk.bf16.vlgmr.msra.gmra.mxu0 %vm65_vm0, %v37_v9  ;;  %111 = vmatpush.msra.mxu1 %v100_v10  ;;  %v93_v18 = vld [vmem:[%s362_s5 + $0x28] sm:$0xff]  ;;  %v92_v19 = vld [vmem:[%s362_s5 + $0x20] sm:$0xff]  ;;  %v91_v20 = vld [vmem:[%s362_s5 + $0x18] sm:$0xff] }
   0xc   :  { %v90_v21 = vld [vmem:[%s362_s5 + $0x10] sm:$0xff]  ;;  %v89_v22 = vld [vmem:[%s362_s5 + $0x8] sm:$0xff]  ;;  %v88_v23 = vld [vmem:[%s362_s5] sm:$0xff] }
   0xd   :  { %133 = vperm.xlu0 %197, %v130_v11   ;;  %112 = vmatpush.msra.mxu1 %v99_v12  ;;  %v198_v24 = vld [vmem:[%s360_s3] ss:$0 sm:$0xff] }
   0xe   :  { %v199_v27 = vld [vmem:[%s361_s4] ss:$0 sm:$0xff]  ;;  %s228_s4 = smov [#allocation3]  }
   0xf   :  { %113 = vmatpush.msra.mxu1 %v98_v13  ;;  %v200_v33 = vld [vmem:[%s363_s6] ss:$0 sm:$0xff]  ;;  %s171_s28 = sshll.u32 %s228_s4, 4  ;;  %s172_s28 = int_to_ptr.vmem [resolvable:$true] %s171_s28 }
  0x10   :  { %v129_v37 = vld [vmem:[%s364_s7] sm:$0x1] }
  0x11   :  { %114 = vmatpush.msra.mxu1 %v97_v14 }
  0x13   :  { %115 = vmatpush.msra.mxu1 %v96_v15 }
  0x15   :  { %116 = vmatpush.msra.mxu1 %v95_v16 }
  0x17   :  { %117 = vmatpush.msra.mxu1 %v94_v17 }
  0x19   :  { %118 = vmatpush.msra.mxu1 %v93_v18 }
  0x1b   :  { %119 = vmatpush.msra.mxu1 %v92_v19 }
  0x1d   :  { %120 = vmatpush.msra.mxu1 %v91_v20 }
  0x1f   :  { %121 = vmatpush.msra.mxu1 %v90_v21 }
  0x21   :  { %122 = vmatpush.msra.mxu1 %v89_v22 }
  0x23   :  { %123 = vmatpush.msra.mxu1 %v88_v23 }
  0x77   :  { %v47_v25 = vpop.permute.xlu0 %46 }
  0x78   :  { %v52_v26 = vmul.f32 %v198_v24, %v47_v25 }
  0x7f   :  { %v134_v38 = vpop.permute.xlu0 %133 }
  0x80   :  { %v136_v39 = vperm.slane %v134_v38, 0 }
  0x88   :  { %v78_v28 = vpop.f32.mrf.mxu0 }
  0x89   :  { %v79_v29 = vadd.f32 %v78_v28, %v52_v26 }
  0x8b   :  { %v86_v30 = vadd.f32 %v199_v27, %v79_v29 }
  0x8d   :  { %v87_v31 = vmax.f32 %v86_v30, 0.0 }
  0x8f   :  { %124 = vmatmul.f32.vlgmr.msra.gmra.mxu1 %v87_v31 }
  0x90   :  { %v80_v32 = vpop.f32.mrf.mxu0 }
 0x10c   :  { %v125_v34 = vpop.f32.mrf.mxu1 }
 0x10d   :  { %v126_v35 = vadd.f32 %v200_v33, %v125_v34 }
 0x10f   :  { %v128_v36 = vmax.f32 %v126_v35, 0.0 }
 0x111   :  { %191 = vmatpush.xpose.msk.msra.mxu2 %vm137_vm1, %v128_v36 }
 0x114   :  { %192 = vmatmul.msk.f32.vlgmr.msra.gmra.mxu2 %vm137_vm1, %v129_v37 }
 0x197   :  { %v161_v40 = vpop.f32.mrf.mxu2 }
 0x198   :  { %v162_v41 = vadd.f32 %v161_v40, %v136_v39 }
 0x19a   :  { %165 = vst.msk [vmem:[#allocation3] sm:$0x1] %vm164_vm2, %v162_v41 }
 0x19b   :  { %176 = dma.vmem_to_hbm [thread:$0]  %s172_s28, 16, %s174_s10, [#allocation4]  }
 0x19c   :  { %225 = dma.done.wait [#allocation4], 16  }
 0x19d   :  { %226 = vsyncadd [#allocation4], 4294967280 }
 0x19e   :  { %181 = vsyncpa [#allocation4], 1 }

</bundles_post_ra>
